<compile_context>
chip_gen: v6e
topology: v6e:2x2x1
jax: 0.10.0
libtpu: 0.0.40
codegen_flags: <defaults>
</compile_context>

<pallas_src>
import functools

import jax
import jax.numpy as jnp
from jax.experimental import pallas as pl
from jax.experimental.pallas import tpu as pltpu

_LANES = 128


def _swish_kernel(x_ref, o_ref, *, compute_dtype):
    x = x_ref[...].astype(compute_dtype)
    # sigmoid lowers to EUP ops — hidden under the DMA for this HBM-bound kernel.
    o_ref[...] = (x * jax.nn.sigmoid(x)).astype(o_ref.dtype)


def _chip_info():
    """Best-effort chip / VMEM discovery with conservative fallbacks."""
    kind = ""
    try:
        kind = jax.devices()[0].device_kind.lower()
    except Exception:
        pass
    is_v7 = ("v7" in kind) or ("7x" in kind)
    is_v6 = "v6" in kind
    vmem_cap = None
    try:
        vmem_cap = int(pltpu.get_tpu_info().vmem_capacity_bytes)
    except Exception:
        vmem_cap = None
    if not vmem_cap or vmem_cap <= 0:
        # v7x: 64 MiB per TensorCore; v5e/v6e: 128 MiB.
        vmem_cap = (64 << 20) if is_v7 else (128 << 20)
    return is_v7, is_v6, vmem_cap


def _sublane_multiple(dtype) -> int:
    # f32 packs 8 rows / vreg sublane tile, bf16 16, int8/fp8 32.
    itemsize = jnp.dtype(dtype).itemsize
    return max(8, 32 // max(1, itemsize))


def _swish_2d(x2d, *, tile_rows, compute_dtype, dim_sem, vmem_limit):
    rows, lanes = x2d.shape
    dtype = x2d.dtype
    itemsize = jnp.dtype(dtype).itemsize
    n = rows * lanes
    grid = (pl.cdiv(rows, tile_rows),)
    cost = pl.CostEstimate(
        flops=2 * n, transcendentals=n, bytes_accessed=2 * n * itemsize
    )
    return pl.pallas_call(
        functools.partial(_swish_kernel, compute_dtype=compute_dtype),
        out_shape=jax.ShapeDtypeStruct((rows, lanes), dtype),
        grid_spec=pltpu.PrefetchScalarGridSpec(
            num_scalar_prefetch=0,
            grid=grid,
            in_specs=[pl.BlockSpec((tile_rows, lanes), lambda i: (i, 0))],
            out_specs=pl.BlockSpec((tile_rows, lanes), lambda i: (i, 0)),
        ),
        compiler_params=pltpu.CompilerParams(
            dimension_semantics=dim_sem,
            vmem_limit_bytes=vmem_limit,
        ),
        cost_estimate=cost,
    )(x2d)


def swish(x: jax.Array) -> jax.Array:
    """Elementwise swish: x * sigmoid(x). Any shape/dtype."""
    orig_shape = x.shape
    dtype = x.dtype
    itemsize = jnp.dtype(dtype).itemsize
    n_elem = x.size
    if n_elem == 0:
        return x

    is_v7, is_v6, vmem_cap = _chip_info()

    # bf16 VPU/EUP exist on v6e/v7x only; v5e keeps the f32 compute path.
    if dtype == jnp.bfloat16 and (is_v6 or is_v7):
        compute_dtype = jnp.bfloat16
    else:
        compute_dtype = jnp.float32

    # --- VMEM-aware block sizing ------------------------------------------
    # in + out, double-buffered => 4x block bytes resident; keep that at
    # ~half of physical VMEM.  vmem_cap//8 gives 16 MiB/block on 128 MiB
    # chips (v5e/v6e) and 8 MiB/block on 64 MiB v7x; 16 MiB absolute cap.
    max_block_bytes = min(16 << 20, vmem_cap // 8)
    sublane = _sublane_multiple(dtype)
    tile_rows = max(
        sublane, (max_block_bytes // (_LANES * itemsize)) // sublane * sublane
    )
    block_bytes = tile_rows * _LANES * itemsize
    vmem_limit = int(min(vmem_cap - (8 << 20), 4 * block_bytes + (16 << 20)))
    vmem_limit = max(vmem_limit, 16 << 20)

    # Only CORE_PARALLEL engages the second TensorCore on v7x; plain
    # "parallel" is kept on single-TC chips (no codegen impact there).
    if is_v7:
        dim_sem = (getattr(pltpu, "CORE_PARALLEL", "parallel"),)
    else:
        dim_sem = ("parallel",)

    def run_bulk(x2d):
        rows = x2d.shape[0]
        tr = tile_rows
        if rows <= tr:
            tr = rows  # single full-extent block — always layout-legal
        return _swish_2d(
            x2d,
            tile_rows=tr,
            compute_dtype=compute_dtype,
            dim_sem=dim_sem,
            vmem_limit=vmem_limit,
        )

    rem = n_elem % _LANES
    bulk = n_elem - rem

    if rem == 0:
        # fast path: no pad, no slice, no concat
        out2d = run_bulk(jnp.reshape(x, (n_elem // _LANES, _LANES)))
        return out2d.reshape(orig_shape)

    # Ragged path: stream the 128-aligned bulk through the kernel, handle the
    # <128-element tail with plain jnp (no full-tensor pad/trim round trips).
    x_flat = jnp.ravel(x)
    tail = x_flat[bulk:].astype(jnp.float32)
    tail_out = (tail * jax.nn.sigmoid(tail)).astype(dtype)
    if bulk == 0:
        return tail_out.reshape(orig_shape)
    bulk_out = run_bulk(x_flat[:bulk].reshape(bulk // _LANES, _LANES))
    out_flat = jnp.concatenate([bulk_out.reshape(-1), tail_out])
    return out_flat.reshape(orig_shape)


if __name__ == "__main__":
    key = jax.random.PRNGKey(0)

    # NCHW input matching the torch module's expected conv layout
    x = jax.random.normal(key, (2, 4, 16, 16), dtype=jnp.float32)
    y = swish(x)
    jax.block_until_ready(y)
    y_ref = x * jax.nn.sigmoid(x)
    assert y.shape == x.shape and y.dtype == x.dtype
    assert jnp.allclose(y, y_ref, atol=1e-6, rtol=1e-6)

    # ragged path: 128-aligned bulk via the kernel + <128-element tail via jnp
    k1, k2 = jax.random.split(jax.random.PRNGKey(1))
    x2 = jax.random.normal(k1, (5, 131), dtype=jnp.float32)
    y2 = swish(x2)
    jax.block_until_ready(y2)
    assert y2.shape == x2.shape and y2.dtype == x2.dtype
    assert jnp.allclose(y2, x2 * jax.nn.sigmoid(x2), atol=1e-6, rtol=1e-6)

    # tiny (<128 elements) pure-tail path
    x3 = jax.random.normal(k2, (3, 5, 7), dtype=jnp.float32)
    y3 = swish(x3)
    jax.block_until_ready(y3)
    assert jnp.allclose(y3, x3 * jax.nn.sigmoid(x3), atol=1e-6, rtol=1e-6)

    # bf16 path (bf16 compute on v6e/v7x, f32 on v5e)
    xb = jax.random.normal(jax.random.PRNGKey(2), (2, 4, 16, 16)).astype(jnp.bfloat16)
    yb = swish(xb)
    jax.block_until_ready(yb)
    yb_ref = (
        xb.astype(jnp.float32) * jax.nn.sigmoid(xb.astype(jnp.float32))
    ).astype(jnp.bfloat16)
    assert yb.shape == xb.shape and yb.dtype == jnp.bfloat16
    assert jnp.allclose(
        yb.astype(jnp.float32), yb_ref.astype(jnp.float32), atol=5e-2, rtol=5e-2
    )

    print("KERNEL_OK")
</pallas_src>

<mosaic_0001>
module attributes {stable_mosaic.version = 11 : i64} {
  func.func @_swish_kernel(%arg0: i32, %arg1: memref<16x128xf32, #tpu.memory_space<vmem>>, %arg2: memref<16x128xf32, #tpu.memory_space<vmem>>) attributes {dimension_semantics = [#tpu.dimension_semantics<parallel>], iteration_bounds = array<i64: 1>, scalar_prefetch = 0 : i64, scratch_operands = 0 : i64, tpu.core_type = #tpu.core_type<tc>, window_params = [{transform_indices = @transform_0, window_bounds = array<i64: 16, 128>}, {transform_indices = @transform_1, window_bounds = array<i64: 16, 128>}]} {
    %c0 = arith.constant 0 : index
    %c0_0 = arith.constant 0 : index
    %0 = vector.load %arg1[%c0, %c0_0] : memref<16x128xf32, #tpu.memory_space<vmem>>, vector<16x128xf32>
    %1 = arith.negf %0 : vector<16x128xf32>
    %2 = math.exp %1 : vector<16x128xf32>
    %cst = arith.constant 1.000000e+00 : f32
    %3 = vector.broadcast %cst : f32 to vector<16x128xf32>
    %4 = arith.addf %3, %2 : vector<16x128xf32>
    %5 = arith.divf %3, %4 : vector<16x128xf32>
    %6 = arith.mulf %0, %5 : vector<16x128xf32>
    %c0_1 = arith.constant 0 : index
    %c0_2 = arith.constant 0 : index
    %7 = vector.load %arg2[%c0_1, %c0_2] : memref<16x128xf32, #tpu.memory_space<vmem>>, vector<16x128xf32>
    tpu.vector_store %arg2[%c0_1, %c0_2], %6 {strides = array<i32>} : memref<16x128xf32, #tpu.memory_space<vmem>>, vector<16x128xf32>,
    return
  }
  func.func @transform_0(%arg0: i32) -> (i32, i32) {
    %c0_i32 = arith.constant 0 : i32
    %c0_i32_0 = arith.constant 0 : i32
    return %arg0, %c0_i32 : i32, i32
  }
  func.func @transform_1(%arg0: i32) -> (i32, i32) {
    %c0_i32 = arith.constant 0 : i32
    %c0_i32_0 = arith.constant 0 : i32
    return %arg0, %c0_i32 : i32, i32
  }
}

</mosaic_0001>

<bundles_post_ra>
// kernel: tpu_custom_call.1
= control target key start
LH: loop header
LB: loop body
LE: loop exit
PB: predicated region body
PF: predicated region fallthrough
CT: control target
= control target key end

     0   :  { %6 = vsyncpa [#allocation3], 0  ;;  %s142_s0 = inlined_call_operand.hbm [shape: f32[16,128], index: 0, kind: input, shape index: {}]   ;;  %s143_s1 = inlined_call_operand.hbm [shape: f32[16,128], index: 1, kind: output, shape index: {}]  }
   0x1   :  { %7 = vsyncpa [#allocation4], 0  ;;  %s116_s6 = smov [#allocation2]  }
   0x2   :  { %s13_s7 = sshll.u32 %s116_s6, 4  ;;  %s14_s7 = int_to_ptr.vmem [resolvable:$true] %s13_s7 }
   0x3   :  { %s80_s8 = scalar_lea.vmem %s14_s7, 256  ;;  %p85_p1 = scmp.lt.s32.totalorder %s14_s7, %s14_s7 }
   0x4   :  { %p81_p0 = scmp.ne.s32.totalorder %s14_s7, %s80_s8  ;;  %p86_p2 = scmp.lt.s32.totalorder %s80_s8, %s80_s8 }
   0x6   :  { %p87_p3 = por %p86_p2, %p85_p1 }
   0x8   :  { %p88_p4 = pnand %p87_p3, %p81_p0 }
   0xa   :  { %91 = shalt.err (!%p88_p4)
}
   0xb   :  { %s117_s9 = smov 128   ;;  %s118_s10 = smov 8  }
   0xc   :  { %19 = dma.hbm_to_vmem [thread:$0]  %s142_s0, 256, %s14_s7, [#allocation3], %s117_s9, %s117_s9, %s118_s10  }
   0xd   :  { %112 = dma.done.wait [#allocation3], 256  }
   0xe   :  { %113 = vsyncadd [#allocation3], 4294967040  ;;  %v23_v0 = vld [vmem:[#allocation2] sm:$0xff]  ;;  %v24_v1 = vld [vmem:[#allocation2 + $0x8] sm:$0xff]  ;;  %s119_s13 = smov [#allocation5]  }
   0xf   :  { %v58_v2 = vmul.f32 -1.442695, %v23_v0  ;;  %v59_v3 = vmul.f32 -1.442695, %v24_v1  ;;  %s46_s14 = sshll.u32 %s119_s13, 4  ;;  %s47_s14 = int_to_ptr.vmem [resolvable:$true] %s46_s14 }
  0x10   :  { %s92_s0 = scalar_lea.vmem %s47_s14, 256  ;;  %p97_p6 = scmp.lt.s32.totalorder %s47_s14, %s47_s14 }
  0x11   :  { %64 = vpow2.f32 %v58_v2  ;;  %p93_p5 = scmp.ne.s32.totalorder %s47_s14, %s92_s0  ;;  %p98_p7 = scmp.lt.s32.totalorder %s92_s0, %s92_s0 }
  0x12   :  { %66 = vpow2.f32 %v59_v3 }
  0x13   :  { %p99_p8 = por %p98_p7, %p97_p6 }
  0x15   :  { %p100_p9 = pnand %p99_p8, %p93_p5 }
  0x1e   :  { %v65_v4 = vpop.eup %64 }
  0x1f   :  { %v67_v5 = vpop.eup %66  ;;  %v31_v6 = vadd.f32 1.0, %v65_v4 }
  0x20   :  { %v32_v7 = vadd.f32 1.0, %v67_v5 }
  0x21   :  { %68 = vrcp.f32 %v31_v6 }
  0x22   :  { %70 = vrcp.f32 %v32_v7 }
  0x2e   :  { %v69_v8 = vpop.eup %68 }
  0x2f   :  { %v71_v9 = vpop.eup %70  ;;  %v37_v10 = vmul.f32 %v69_v8, %v23_v0 }
  0x30   :  { %v38_v11 = vmul.f32 %v71_v9, %v24_v1 }
  0x31   :  { %39 = vst [vmem:[#allocation5] sm:$0xff] %v37_v10 }
  0x32   :  { %40 = vst [vmem:[#allocation5 + $0x8] sm:$0xff] %v38_v11 }
  0x33   :  { %103 = shalt.err (!%p100_p9)
}
  0x34   :  { %52 = dma.vmem_to_hbm [thread:$0]  %s47_s14, 256, %s143_s1, [#allocation4], %s117_s9, %s117_s9, %s118_s10  }
  0x35   :  { %114 = dma.done.wait [#allocation4], 256  }
  0x36   :  { %115 = vsyncadd [#allocation4], 4294967040 }
  0x37   :  { %56 = vsyncpa [#allocation3], 1 }
  0x38   :  { %57 = vsyncpa [#allocation4], 1 }

</bundles_post_ra>
